<compile_context>
chip_gen: v7x
topology: tpu7x:2x2x1
jax: 0.10.0
libtpu: 0.0.40
codegen_flags: <defaults>
</compile_context>

<pallas_src>
import jax
import jax.numpy as jnp
from jax.experimental import pallas as pl
from jax.experimental.pallas import tpu as pltpu

_LANE = 128


def mlp_kernel(x_ref,
               w1_ref, b1_ref,
               w2_ref, b2_ref,
               w3_ref, b3_ref,
               w4_ref, b4_ref,
               o_ref):
    # x_ref: (D, TB) — batch on the lane axis. Weights are (out, in), biases (out, 1).
    x = x_ref[...]

    h = jnp.dot(w1_ref[...], x, preferred_element_type=jnp.float32) + b1_ref[...]
    h = jnp.maximum(h, 0.0)                                     # (64, TB)

    h = jnp.dot(w2_ref[...], h, preferred_element_type=jnp.float32) + b2_ref[...]
    h = jnp.maximum(h, 0.0)                                     # (32, TB)

    h = jnp.dot(w3_ref[...], h, preferred_element_type=jnp.float32) + b3_ref[...]
    h = jnp.maximum(h, 0.0)                                     # (16, TB)

    z = jnp.dot(w4_ref[...], h, preferred_element_type=jnp.float32) + b4_ref[...]
    # sigmoid via EUP exp + EUP approx reciprocal (keeps the VALU free)
    o_ref[...] = pl.reciprocal(1.0 + jnp.exp(-z), approx=True)  # (1, TB) lane-dense


def _round_up(n, m):
    return ((n + m - 1) // m) * m


def nn_model_forward(x, params, *, tile_b=256):
    """x: (B, D) float32. params: {'w1'..'w4': (in,out), 'b1'..'b4': (1,out)}."""
    B, D = x.shape
    # Lane-aligned batch tile: >=128, <=tile_b, and no bigger than the padded batch.
    # (Keep <=512 unless intermediates move to VMEM scratch — vreg pressure.)
    tile = max(_LANE, min(_round_up(tile_b, _LANE), _round_up(B, _LANE)))
    b_pad = _round_up(B, tile)
    grid = (b_pad // tile,)

    # Feature-major input, batch on lanes, zero-padded to b_pad.
    x_t = jnp.zeros((D, b_pad), jnp.float32).at[:, :B].set(x.T)

    # One-time param prep: weights (out, in), biases (out, 1) columns.
    w1t, w2t, w3t, w4t = (params[f"w{i}"].T for i in range(1, 5))
    b1c, b2c, b3c, b4c = (params[f"b{i}"].reshape(-1, 1) for i in range(1, 5))

    def full_spec(a):
        # whole array, same block every step -> resident in VMEM across the grid
        return pl.BlockSpec(a.shape, lambda i: (0, 0))

    out_row = pl.pallas_call(
        mlp_kernel,
        out_shape=jax.ShapeDtypeStruct((1, b_pad), jnp.float32),
        grid=grid,
        in_specs=[
            pl.BlockSpec((D, tile), lambda i: (0, i)),   # input tile over batch (lanes)
            full_spec(w1t), full_spec(b1c),
            full_spec(w2t), full_spec(b2c),
            full_spec(w3t), full_spec(b3c),
            full_spec(w4t), full_spec(b4c),
        ],
        out_specs=pl.BlockSpec((1, tile), lambda i: (0, i)),   # lane-dense output row
        compiler_params=pltpu.CompilerParams(
            dimension_semantics=("parallel",),   # batch tiles shard across v7x's 2 TCs
        ),
    )(x_t, w1t, b1c, w2t, b2c, w3t, b3c, w4t, b4c)

    return out_row[0, :B].reshape(B, 1)


def init_params(key, input_dim):
    # Deterministic synthetic init (PyTorch-like uniform(-1/sqrt(fan_in), +)).
    # Weights stored transposed relative to nn.Linear: (in, out); biases (1, out).
    dims = [(input_dim, 64), (64, 32), (32, 16), (16, 1)]
    params = {}
    for idx, (fan_in, fan_out) in enumerate(dims, start=1):
        key, kw, kb = jax.random.split(key, 3)
        bound = 1.0 / jnp.sqrt(jnp.float32(fan_in))
        params[f"w{idx}"] = jax.random.uniform(
            kw, (fan_in, fan_out), jnp.float32, -bound, bound)
        params[f"b{idx}"] = jax.random.uniform(
            kb, (1, fan_out), jnp.float32, -bound, bound)
    return params


def ref_forward(x, params):
    h = x
    for i in (1, 2, 3):
        h = jnp.maximum(h @ params[f"w{i}"] + params[f"b{i}"], 0.0)
    z = h @ params["w4"] + params["b4"]
    return jax.nn.sigmoid(z)


if __name__ == "__main__":
    key = jax.random.PRNGKey(0)
    key, kx = jax.random.split(key)

    B, input_dim = 16, 8            # small demo batch, small feature dim
    x = jax.random.normal(kx, (B, input_dim), jnp.float32)
    params = init_params(key, input_dim)

    out = jax.block_until_ready(nn_model_forward(x, params))
    ref = ref_forward(x, params)
    assert out.shape == (B, 1)
    # atol covers the EUP approx-reciprocal in the sigmoid
    assert jnp.allclose(out, ref, atol=2e-3), "mismatch vs reference (small batch)"

    # Exercise the padded, multi-tile (multi-step parallel grid) path as well.
    key, kx2 = jax.random.split(key)
    B2 = 600
    x2 = jax.random.normal(kx2, (B2, input_dim), jnp.float32)
    out2 = jax.block_until_ready(nn_model_forward(x2, params, tile_b=256))
    ref2 = ref_forward(x2, params)
    assert out2.shape == (B2, 1)
    assert jnp.allclose(out2, ref2, atol=2e-3), "mismatch vs reference (multi-tile)"

    print("KERNEL_OK")
</pallas_src>

<mosaic_0001>
module attributes {stable_mosaic.version = 11 : i64} {
  func.func @mlp_kernel(%arg0: i32, %arg1: memref<8x128xf32, #tpu.memory_space<vmem>>, %arg2: memref<64x8xf32, #tpu.memory_space<vmem>>, %arg3: memref<64x1xf32, #tpu.memory_space<vmem>>, %arg4: memref<32x64xf32, #tpu.memory_space<vmem>>, %arg5: memref<32x1xf32, #tpu.memory_space<vmem>>, %arg6: memref<16x32xf32, #tpu.memory_space<vmem>>, %arg7: memref<16x1xf32, #tpu.memory_space<vmem>>, %arg8: memref<1x16xf32, #tpu.memory_space<vmem>>, %arg9: memref<1x1xf32, #tpu.memory_space<vmem>>, %arg10: memref<1x128xf32, #tpu.memory_space<vmem>>) attributes {dimension_semantics = [#tpu.dimension_semantics<parallel>], iteration_bounds = array<i64: 1>, scalar_prefetch = 0 : i64, scratch_operands = 0 : i64, tpu.core_type = #tpu.core_type<tc>, window_params = [{transform_indices = @transform_0, window_bounds = array<i64: 8, 128>}, {pipeline_mode = #tpu.pipeline_mode<synchronous>, transform_indices = @transform_1, window_bounds = array<i64: 64, 8>}, {pipeline_mode = #tpu.pipeline_mode<synchronous>, transform_indices = @transform_2, window_bounds = array<i64: 64, 1>}, {pipeline_mode = #tpu.pipeline_mode<synchronous>, transform_indices = @transform_3, window_bounds = array<i64: 32, 64>}, {pipeline_mode = #tpu.pipeline_mode<synchronous>, transform_indices = @transform_4, window_bounds = array<i64: 32, 1>}, {pipeline_mode = #tpu.pipeline_mode<synchronous>, transform_indices = @transform_5, window_bounds = array<i64: 16, 32>}, {pipeline_mode = #tpu.pipeline_mode<synchronous>, transform_indices = @transform_6, window_bounds = array<i64: 16, 1>}, {pipeline_mode = #tpu.pipeline_mode<synchronous>, transform_indices = @transform_7, window_bounds = array<i64: 1, 16>}, {pipeline_mode = #tpu.pipeline_mode<synchronous>, transform_indices = @transform_8, window_bounds = array<i64: 1, 1>}, {transform_indices = @transform_9, window_bounds = array<i64: 1, 128>}]} {
    %c0 = arith.constant 0 : index
    %c0_0 = arith.constant 0 : index
    %0 = vector.load %arg1[%c0, %c0_0] : memref<8x128xf32, #tpu.memory_space<vmem>>, vector<8x128xf32>
    %c0_1 = arith.constant 0 : index
    %c0_2 = arith.constant 0 : index
    %1 = vector.load %arg2[%c0_1, %c0_2] : memref<64x8xf32, #tpu.memory_space<vmem>>, vector<64x8xf32>
    %cst = arith.constant dense<0.000000e+00> : vector<64x128xf32>
    %2 = tpu.matmul %1, %0, %cst {dimension_numbers = #tpu.dot_dimension_numbers<[1], [0], [0], [1], [0, 0, 1, 1], [], []>} : vector<64x8xf32>, vector<8x128xf32>, vector<64x128xf32> -> vector<64x128xf32>
    %c0_3 = arith.constant 0 : index
    %c0_4 = arith.constant 0 : index
    %3 = vector.load %arg3[%c0_3, %c0_4] : memref<64x1xf32, #tpu.memory_space<vmem>>, vector<64x1xf32>
    %4 = vector.broadcast %3 : vector<64x1xf32> to vector<64x128xf32>
    %5 = arith.addf %2, %4 : vector<64x128xf32>
    %cst_5 = arith.constant 0.000000e+00 : f32
    %6 = vector.broadcast %cst_5 : f32 to vector<64x128xf32>
    %7 = arith.maximumf %5, %6 : vector<64x128xf32>
    %c0_6 = arith.constant 0 : index
    %c0_7 = arith.constant 0 : index
    %8 = vector.load %arg4[%c0_6, %c0_7] : memref<32x64xf32, #tpu.memory_space<vmem>>, vector<32x64xf32>
    %cst_8 = arith.constant dense<0.000000e+00> : vector<32x128xf32>
    %9 = tpu.matmul %8, %7, %cst_8 {dimension_numbers = #tpu.dot_dimension_numbers<[1], [0], [0], [1], [0, 0, 1, 1], [], []>} : vector<32x64xf32>, vector<64x128xf32>, vector<32x128xf32> -> vector<32x128xf32>
    %c0_9 = arith.constant 0 : index
    %c0_10 = arith.constant 0 : index
    %10 = vector.load %arg5[%c0_9, %c0_10] : memref<32x1xf32, #tpu.memory_space<vmem>>, vector<32x1xf32>
    %11 = vector.broadcast %10 : vector<32x1xf32> to vector<32x128xf32>
    %12 = arith.addf %9, %11 : vector<32x128xf32>
    %cst_11 = arith.constant 0.000000e+00 : f32
    %13 = vector.broadcast %cst_11 : f32 to vector<32x128xf32>
    %14 = arith.maximumf %12, %13 : vector<32x128xf32>
    %c0_12 = arith.constant 0 : index
    %c0_13 = arith.constant 0 : index
    %15 = vector.load %arg6[%c0_12, %c0_13] : memref<16x32xf32, #tpu.memory_space<vmem>>, vector<16x32xf32>
    %cst_14 = arith.constant dense<0.000000e+00> : vector<16x128xf32>
    %16 = tpu.matmul %15, %14, %cst_14 {dimension_numbers = #tpu.dot_dimension_numbers<[1], [0], [0], [1], [0, 0, 1, 1], [], []>} : vector<16x32xf32>, vector<32x128xf32>, vector<16x128xf32> -> vector<16x128xf32>
    %c0_15 = arith.constant 0 : index
    %c0_16 = arith.constant 0 : index
    %17 = vector.load %arg7[%c0_15, %c0_16] : memref<16x1xf32, #tpu.memory_space<vmem>>, vector<16x1xf32>
    %18 = vector.broadcast %17 : vector<16x1xf32> to vector<16x128xf32>
    %19 = arith.addf %16, %18 : vector<16x128xf32>
    %cst_17 = arith.constant 0.000000e+00 : f32
    %20 = vector.broadcast %cst_17 : f32 to vector<16x128xf32>
    %21 = arith.maximumf %19, %20 : vector<16x128xf32>
    %c0_18 = arith.constant 0 : index
    %c0_19 = arith.constant 0 : index
    %22 = vector.load %arg8[%c0_18, %c0_19] : memref<1x16xf32, #tpu.memory_space<vmem>>, vector<1x16xf32>
    %cst_20 = arith.constant dense<0.000000e+00> : vector<1x128xf32>
    %23 = tpu.matmul %22, %21, %cst_20 {dimension_numbers = #tpu.dot_dimension_numbers<[1], [0], [0], [1], [0, 0, 1, 1], [], []>} : vector<1x16xf32>, vector<16x128xf32>, vector<1x128xf32> -> vector<1x128xf32>
    %c0_21 = arith.constant 0 : index
    %c0_22 = arith.constant 0 : index
    %24 = vector.load %arg9[%c0_21, %c0_22] : memref<1x1xf32, #tpu.memory_space<vmem>>, vector<1x1xf32>
    %25 = vector.broadcast %24 : vector<1x1xf32> to vector<1x128xf32>
    %26 = arith.addf %23, %25 : vector<1x128xf32>
    %cst_23 = arith.constant 0.000000e+00 : f32
    %27 = vector.broadcast %cst_23 : f32 to vector<1x128xf32>
    %28 = arith.subf %27, %26 : vector<1x128xf32>
    %29 = math.exp %28 : vector<1x128xf32>
    %cst_24 = arith.constant 1.000000e+00 : f32
    %30 = vector.broadcast %cst_24 : f32 to vector<1x128xf32>
    %31 = arith.addf %30, %29 : vector<1x128xf32>
    %32 = tpu.reciprocal %31 {approx = true} : vector<1x128xf32> -> vector<1x128xf32>
    %c0_25 = arith.constant 0 : index
    %c0_26 = arith.constant 0 : index
    %33 = vector.load %arg10[%c0_25, %c0_26] : memref<1x128xf32, #tpu.memory_space<vmem>>, vector<1x128xf32>
    tpu.vector_store %arg10[%c0_25, %c0_26], %32 {strides = array<i32>} : memref<1x128xf32, #tpu.memory_space<vmem>>, vector<1x128xf32>,
    return
  }
  func.func @transform_0(%arg0: i32) -> (i32, i32) {
    %c0_i32 = arith.constant 0 : i32
    %c0_i32_0 = arith.constant 0 : i32
    return %c0_i32, %arg0 : i32, i32
  }
  func.func @transform_1(%arg0: i32) -> (i32, i32) {
    %c0_i32 = arith.constant 0 : i32
    %c0_i32_0 = arith.constant 0 : i32
    %c0_i32_1 = arith.constant 0 : i32
    return %c0_i32, %c0_i32_0 : i32, i32
  }
  func.func @transform_2(%arg0: i32) -> (i32, i32) {
    %c0_i32 = arith.constant 0 : i32
    %c0_i32_0 = arith.constant 0 : i32
    %c0_i32_1 = arith.constant 0 : i32
    return %c0_i32, %c0_i32_0 : i32, i32
  }
  func.func @transform_3(%arg0: i32) -> (i32, i32) {
    %c0_i32 = arith.constant 0 : i32
    %c0_i32_0 = arith.constant 0 : i32
    %c0_i32_1 = arith.constant 0 : i32
    return %c0_i32, %c0_i32_0 : i32, i32
  }
  func.func @transform_4(%arg0: i32) -> (i32, i32) {
    %c0_i32 = arith.constant 0 : i32
    %c0_i32_0 = arith.constant 0 : i32
    %c0_i32_1 = arith.constant 0 : i32
    return %c0_i32, %c0_i32_0 : i32, i32
  }
  func.func @transform_5(%arg0: i32) -> (i32, i32) {
    %c0_i32 = arith.constant 0 : i32
    %c0_i32_0 = arith.constant 0 : i32
    %c0_i32_1 = arith.constant 0 : i32
    return %c0_i32, %c0_i32_0 : i32, i32
  }
  func.func @transform_6(%arg0: i32) -> (i32, i32) {
    %c0_i32 = arith.constant 0 : i32
    %c0_i32_0 = arith.constant 0 : i32
    %c0_i32_1 = arith.constant 0 : i32
    return %c0_i32, %c0_i32_0 : i32, i32
  }
  func.func @transform_7(%arg0: i32) -> (i32, i32) {
    %c0_i32 = arith.constant 0 : i32
    %c0_i32_0 = arith.constant 0 : i32
    %c0_i32_1 = arith.constant 0 : i32
    return %c0_i32, %c0_i32_0 : i32, i32
  }
  func.func @transform_8(%arg0: i32) -> (i32, i32) {
    %c0_i32 = arith.constant 0 : i32
    %c0_i32_0 = arith.constant 0 : i32
    %c0_i32_1 = arith.constant 0 : i32
    return %c0_i32, %c0_i32_0 : i32, i32
  }
  func.func @transform_9(%arg0: i32) -> (i32, i32) {
    %c0_i32 = arith.constant 0 : i32
    %c0_i32_0 = arith.constant 0 : i32
    return %c0_i32, %arg0 : i32, i32
  }
}

</mosaic_0001>

<bundles_post_ra>
// kernel: tpu_custom_call.1
= control target key start
LH: loop header
LB: loop body
LE: loop exit
PB: predicated region body
PF: predicated region fallthrough
CT: control target
= control target key end

     0   :  { %s898_s0 = inlined_call_operand.vmem [shape: f32[8,128], index: 0, kind: input, shape index: {}]   ;;  %s899_s1 = inlined_call_operand.vmem [shape: f32[64,8], index: 1, kind: input, shape index: {}]   ;;  %s900_s2 = inlined_call_operand.vmem [shape: f32[64,1], index: 2, kind: input, shape index: {}]   ;;  %s901_s3 = inlined_call_operand.vmem [shape: f32[32,64], index: 3, kind: input, shape index: {}]   ;;  %s902_s4 = inlined_call_operand.vmem [shape: f32[32,1], index: 4, kind: input, shape index: {}]   ;;  %s903_s5 = inlined_call_operand.vmem [shape: f32[16,32], index: 5, kind: input, shape index: {}]   ;;  %s904_s6 = inlined_call_operand.vmem [shape: f32[16,1], index: 6, kind: input, shape index: {}]   ;;  %s905_s7 = inlined_call_operand.vmem [shape: f32[1,16], index: 7, kind: input, shape index: {}]   ;;  %s906_s8 = inlined_call_operand.<no memory space> [shape: f32[1,1], index: 8, kind: input, shape index: {}]   ;;  %s907_s9 = inlined_call_operand.hbm [shape: f32[1,128], index: 9, kind: output, shape index: {}]  }
   0x1   :  { %v14_v0 = vstv %s906_s8 }
   0x2   :  { %15 = vst [vmem:[#allocation2] sm:$0x1] %v14_v0 }
   0x3   :  { %v35_v1 = vld [vmem:[%s898_s0] sm:$0xff]  ;;  %vm92_vm0 = vcmask 64512   ;;  %v37_v3 = vld [vmem:[%s899_s1 + $0x8] sm:$0xff]  ;;  %v38_v4 = vld [vmem:[%s899_s1 + $0x10] sm:$0xff]  ;;  %v724_v5 = vmov 0  }
   0x4   :  { %v36_v2 = vld [vmem:[%s899_s1] sm:$0xff]  ;;  %608 = vmatprep.subr.mxu0 %v35_v1  ;;  %694 = vset.pattern.permute.xlu0 %v724_v5  ;;  %v46_v7 = vld [vmem:[%s900_s2 + $0x10] sm:$0xff]  ;;  %v39_v8 = vld [vmem:[%s899_s1 + $0x18] sm:$0xff] }
   0x5   :  { %610 = vmatprep.mubr.msk.f32.mxu0 %vm92_vm0, %v36_v2  ;;  %609 = vmatpush3.msra.mxu0 %v35_v1  ;;  %v44_v6 = vld [vmem:[%s900_s2] sm:$0xff]  ;;  %v45_v10 = vld [vmem:[%s900_s2 + $0x8] sm:$0xff]  ;;  %v47_v11 = vld [vmem:[%s900_s2 + $0x18] sm:$0xff] }
   0x6   :  { %611 = vmatmul.mubr.msk.f32.vlgmr.msra.gmra.mrb[0].mxu0 %vm92_vm0, %v37_v3  ;;  %695 = vset.pattern.permute.xlu1 %v724_v5  ;;  %v40_v9 = vld [vmem:[%s899_s1 + $0x20] sm:$0xff]  ;;  %v41_v12 = vld [vmem:[%s899_s1 + $0x28] sm:$0xff] }
   0x7   :  { %613 = vmatprep.mubr.msk.f32.mxu0 %vm92_vm0, %v38_v4  ;;  %54 = vperm.xlu0 %694, %v44_v6  }
   0x8   :  { %64 = vperm.xlu1 %695, %v46_v7  }
   0xa   :  { %614 = vmatmul.mubr.msk.f32.gmra.mrb[2].mxu0 %vm92_vm0, %v39_v8 }
   0xb   :  { %616 = vmatprep.mubr.msk.f32.mxu0 %vm92_vm0, %v40_v9  ;;  %59 = vperm.xlu0 %694, %v45_v10  }
   0xc   :  { %16 = vsyncpa [#allocation4], 0  ;;  %v42_v13 = vld [vmem:[%s899_s1 + $0x30] sm:$0xff]  ;;  %v48_v14 = vld [vmem:[%s900_s2 + $0x20] sm:$0xff]  ;;  %69 = vperm.xlu1 %695, %v47_v11   ;;  %vm258_vm1 = vcmask 523264   ;;  %vm374_vm2 = vcmask 261120  }
   0xd   :  { %v49_v15 = vld [vmem:[%s900_s2 + $0x28] sm:$0xff]  ;;  %v43_v16 = vld [vmem:[%s899_s1 + $0x38] sm:$0xff]  ;;  %v50_v17 = vld [vmem:[%s900_s2 + $0x30] sm:$0xff]  ;;  %vm726_vm3 = vmmov 0   ;;  %vm469_vm4 = vcmask 130048  }
   0xe   :  { %617 = vmatmul.mubr.msk.f32.gmra.mrb[4].mxu0 %vm92_vm0, %v41_v12  ;;  %v51_v18 = vld [vmem:[%s900_s2 + $0x38] sm:$0xff]  ;;  %v234_v19 = vld [vmem:[%s902_s4] sm:$0xff]  ;;  %v235_v20 = vld [vmem:[%s902_s4 + $0x8] sm:$0xff] }
   0xf   :  { %619 = vmatprep.mubr.msk.f32.mxu0 %vm92_vm0, %v42_v13  ;;  %74 = vperm.xlu0 %694, %v48_v14   ;;  %v236_v21 = vld [vmem:[%s902_s4 + $0x10] sm:$0xff]  ;;  %v237_v22 = vld [vmem:[%s902_s4 + $0x18] sm:$0xff]  ;;  %v362_v23 = vld [vmem:[%s904_s6] sm:$0xff] }
  0x10   :  { %79 = vperm.xlu1 %695, %v49_v15   ;;  %v363_v24 = vld [vmem:[%s904_s6 + $0x8] sm:$0xff]  ;;  %v459_v25 = vld [vmem:[#allocation2] sm:$0x1]  ;;  %v232_v0 = vld [vmem:[%s901_s3 + $0x10] sm:$0xff] }
  0x11   :  { %v230_v26 = vld [vmem:[%s901_s3] sm:$0xff]  ;;  %v231_v63 = vld [vmem:[%s901_s3 + $0x8] sm:$0xff]  ;;  %v233_v1 = vld [vmem:[%s901_s3 + $0x18] sm:$0xff] }
  0x12   :  { %620 = vmatmul.mubr.msk.f32.gmra.mrb[6].mxu0 %vm92_vm0, %v43_v16  ;;  %638 = vmatprep.mubr.msk.f32.mxu1 %vm258_vm1, %v230_v26  ;;  %v360_v2 = vld [vmem:[%s903_s5] sm:$0xff] }
  0x13   :  { %84 = vperm.xlu0 %694, %v50_v17   ;;  %652 = vmatprep.mubr.msk.f32.mxu0 %vm374_vm2, %v360_v2 }
  0x14   :  { %89 = vperm.xlu1 %695, %v51_v18  }
  0x17   :  { %240 = vperm.xlu0 %694, %v234_v19  }
  0x18   :  { %245 = vperm.xlu1 %695, %v235_v20  }
  0x1b   :  { %250 = vperm.xlu0 %694, %v236_v21   ;;  %v361_v21 = vld [vmem:[%s903_s5 + $0x8] sm:$0xff]  ;;  %s728_s5 = smov [#allocation3]  }
  0x1c   :  { %255 = vperm.xlu1 %695, %v237_v22   ;;  %v725_v22 = vmov 0.0|0.0   ;;  %s555_s8 = sshll.u32 %s728_s5, 4  ;;  %s556_s8 = int_to_ptr.vmem [resolvable:$true] %s555_s8 }
  0x1d   :  { %s704_s19 = scalar_lea.vmem %s556_s8, 32  ;;  %p705_p1 = scmp.lt.s32.totalorder %s556_s8, %s556_s8 }
  0x1f   :  { %366 = vperm.xlu0 %694, %v362_v23   ;;  %v727_v23 = vmov 0.0  }
  0x20   :  { %371 = vperm.xlu1 %695, %v363_v24  }
  0x23   :  { %462 = vperm.xlu0 %694, %v459_v25  }
  0x86   :  { %v55_v27 = vpop.permute.xlu0 %54 }
  0x87   :  { %v65_v28 = vpop.permute.xlu1 %64 }
  0x8a   :  { %v60_v29 = vpop.permute.xlu0 %59 }
  0x8b   :  { %v70_v30 = vpop.permute.xlu1 %69 }
  0x8e   :  { %v75_v43 = vpop.permute.xlu0 %74 }
  0x8f   :  { %v80_v40 = vpop.permute.xlu1 %79 }
  0x92   :  { %v85_v55 = vpop.permute.xlu0 %84 }
  0x93   :  { %v90_v52 = vpop.permute.xlu1 %89 }
  0x96   :  { %v241_v4 = vpop.permute.xlu0 %240 }
  0x97   :  { %v246_v3 = vpop.permute.xlu1 %245 }
  0x9a   :  { %v251_v13 = vpop.permute.xlu0 %250 }
  0x9b   :  { %v256_v10 = vpop.permute.xlu1 %255 }
  0x9e   :  { %v367_v26 = vpop.permute.xlu0 %366 }
  0x9f   :  { %v372_v24 = vpop.permute.xlu1 %371 }
  0xd9   :  { %v612_v31 = vpop.f32.mrb[0].mxu0 }
  0xda   :  { %v189_v32 = vadd.f32 %v612_v31, %v60_v29  ;;  %v183_v33 = vpop.f32.mrb[1].mxu0 }
  0xdb   :  { %v184_v34 = vadd.f32 %v183_v33, %v55_v27  ;;  %v458_v33 = vld [vmem:[%s905_s7] sm:$0x1]  ;;  %s700_s7 = scalar_lea.vmem %s556_s8, 16 }
  0xdc   :  { %v223_v35 = vmax.f32 %v189_v32, 0.0  ;;  %p701_p0 = scmp.ne.s32.totalorder %s556_s8, %s700_s7  ;;  %p706_p2 = scmp.lt.s32.totalorder %s704_s19, %s700_s7 }
  0xdd   :  { %v222_v36 = vmax.f32 %v184_v34, 0.0  ;;  %v615_v37 = vpop.f32.mrb[2].mxu0  ;;  %v465_v34 = vlaneseq }
  0xde   :  { %v199_v38 = vadd.f32 %v615_v37, %v70_v30  ;;  %v193_v39 = vpop.f32.mrb[3].mxu0  ;;  %v463_v37 = vpop.permute.xlu0 %462  ;;  %p707_p3 = por %p706_p2, %p705_p1 }
  0xdf   :  { %v194_v41 = vadd.f32 %v193_v39, %v65_v28  ;;  %v662_v42 = vpack.c.bf16 %v223_v35, %v222_v36  ;;  %v466_v35 = vshrl.u32 %v465_v34, 7 }
  0xe0   :  { %v225_v44 = vmax.f32 %v199_v38, 0.0  ;;  %p708_p4 = pnand %p707_p3, %p701_p0 }
  0xe1   :  { %v224_v45 = vmax.f32 %v194_v41, 0.0  ;;  %v618_v46 = vpop.f32.mrb[4].mxu0  ;;  %663 = vmatprep.subr.bf16.mxu1 %v662_v42  ;;  %v467_v36 = vsub.s32 0, %v466_v35 }
  0xe2   :  { %v209_v47 = vadd.f32 %v618_v46, %v80_v40  ;;  %v203_v48 = vpop.f32.mrb[5].mxu0  ;;  %665 = vmatpush3.bf16.msra.mxu1 %v662_v42 }
  0xe3   :  { %v666_v49 = vpack.c.bf16 %v225_v44, %v224_v45  ;;  %v204_v50 = vadd.f32 %v203_v48, %v75_v43  ;;  %v468_v38 = vrot.slane %v463_v37, %v467_v36 }
  0xe4   :  { %v227_v51 = vmax.f32 %v209_v47, 0.0 }
  0xe5   :  { %v226_v53 = vmax.f32 %v204_v50, 0.0  ;;  %v621_v54 = vpop.f32.mrb[6].mxu0  ;;  %667 = vmatprep.subr.bf16.mxu1 %v666_v49 }
  0xe6   :  { %v219_v56 = vadd.f32 %v621_v54, %v90_v52  ;;  %v213_v57 = vpop.f32.mrb[7].mxu0  ;;  %669 = vmatpush3.bf16.msra.mxu1 %v666_v49 }
  0xe7   :  { %v670_v58 = vpack.c.bf16 %v227_v51, %v226_v53  ;;  %v214_v59 = vadd.f32 %v213_v57, %v85_v55 }
  0xe8   :  { %v229_v60 = vmax.f32 %v219_v56, 0.0 }
  0xe9   :  { %v228_v61 = vmax.f32 %v214_v59, 0.0  ;;  %671 = vmatprep.subr.bf16.mxu1 %v670_v58 }
  0xea   :  { %673 = vmatpush3.bf16.msra.mxu1 %v670_v58 }
  0xeb   :  { %v674_v62 = vpack.c.bf16 %v229_v60, %v228_v61 }
  0xed   :  { %675 = vmatprep.subr.bf16.mxu1 %v674_v62 }
  0xee   :  { %677 = vmatpush3.bf16.msra.mxu1 %v674_v62 }
  0xf1   :  { %639 = vmatmul.mubr.msk.f32.vlgmr.msra.gmra.mrb[0].mxu1 %vm258_vm1, %v231_v63 }
  0xf2   :  { %641 = vmatprep.mubr.msk.f32.mxu1 %vm258_vm1, %v232_v0 }
  0xf5   :  { %642 = vmatmul.mubr.msk.f32.gmra.mrb[2].mxu1 %vm258_vm1, %v233_v1 }
 0x1c4   :  { %v640_v5 = vpop.f32.mrb[0].mxu1 }
 0x1c5   :  { %v343_v6 = vadd.f32 %v640_v5, %v246_v3  ;;  %v337_v7 = vpop.f32.mrb[1].mxu1 }
 0x1c6   :  { %v338_v8 = vadd.f32 %v337_v7, %v241_v4 }
 0x1c7   :  { %v357_v9 = vmax.f32 %v343_v6, 0.0 }
 0x1c8   :  { %v356_v11 = vmax.f32 %v338_v8, 0.0  ;;  %v643_v12 = vpop.f32.mrb[2].mxu1 }
 0x1c9   :  { %v353_v14 = vadd.f32 %v643_v12, %v256_v10  ;;  %v347_v15 = vpop.f32.mrb[3].mxu1 }
 0x1ca   :  { %v678_v16 = vpack.c.bf16 %v357_v9, %v356_v11  ;;  %v348_v17 = vadd.f32 %v347_v15, %v251_v13 }
 0x1cb   :  { %v359_v18 = vmax.f32 %v353_v14, 0.0 }
 0x1cc   :  { %v358_v19 = vmax.f32 %v348_v17, 0.0  ;;  %679 = vmatprep.subr.bf16.mxu0 %v678_v16 }
 0x1cd   :  { %681 = vmatpush3.bf16.msra.mxu0 %v678_v16 }
 0x1ce   :  { %v682_v20 = vpack.c.bf16 %v359_v18, %v358_v19 }
 0x1d0   :  { %683 = vmatprep.subr.bf16.mxu0 %v682_v20 }
 0x1d1   :  { %685 = vmatpush3.bf16.msra.mxu0 %v682_v20 }
 0x1d2   :  { %686 = vmatprep.subr.bf16.mxu0 %v725_v22 }
 0x1d4   :  { %653 = vmatmul.mubr.msk.f32.vlgmr.msra.gmra.mrb[8].mxu0 %vm374_vm2, %v361_v21 }
 0x1d5   :  { %659 = vmatprep.mubr.msk.f32.mxu0 %vm726_vm3, %v727_v23 }
 0x2a7   :  { %v654_v25 = vpop.f32.mrb[8].mxu0 }
 0x2a8   :  { %v453_v27 = vadd.f32 %v654_v25, %v372_v24  ;;  %v447_v28 = vpop.f32.mrb[9].mxu0 }
 0x2a9   :  { %v448_v29 = vadd.f32 %v447_v28, %v367_v26 }
 0x2aa   :  { %v457_v30 = vmax.f32 %v453_v27, 0.0 }
 0x2ab   :  { %v456_v31 = vmax.f32 %v448_v29, 0.0 }
 0x2ad   :  { %v687_v32 = vpack.c.bf16 %v457_v30, %v456_v31 }
 0x2af   :  { %688 = vmatpush3.bf16.msra.mxu0 %v687_v32 }
 0x2b2   :  { %660 = vmatmul.mubr.msk.f32.vlgmr.msra.gmra.mrb[10].mxu0 %vm469_vm4, %v458_v33 }
 0x385   :  { %v539_v39 = vpop.f32.mrb[10].mxu0 }
 0x386   :  { %v540_v40 = vadd.f32 %v539_v39, %v468_v38  ;;  %v661_v41 = vpop.f32.mrb[11].mxu0 }
 0x388   :  { %v543_v42 = vsub.f32 0.0, %v540_v40 }
 0x38a   :  { %v544_v43 = vmul.f32 1.442695, %v543_v42 }
 0x38c   :  { %696 = vpow2.f32 %v544_v43 }
 0x396   :  { %v697_v44 = vpop.eup %696 }
 0x397   :  { %v546_v45 = vadd.f32 1.0, %v697_v44 }
 0x399   :  { %698 = vrcp.f32 %v546_v45 }
 0x3a3   :  { %v699_v46 = vpop.eup %698 }
 0x3a4   :  { %548 = vst [vmem:[#allocation3] sm:$0x1] %v699_v46 }
 0x3a5   :  { %711 = shalt.err (!%p708_p4)
}
 0x3a6   :  { %s712_s22 = scalar_lea.hbm %s907_s9, 16 }
 0x3a7   :  { %p713_p5 = scmp.ne.s32.totalorder %s907_s9, %s712_s22  ;;  %p716_p6 = scmp.lt.u32.totalorder %s712_s22, %s907_s9 }
 0x3a9   :  { %p718_p7 = pnand %p716_p6, %p713_p5 }
 0x3ab   :  { %721 = shalt.err (!%p718_p7)
}
 0x3ac   :  { %558 = dma.vmem_to_hbm [thread:$0]  %s556_s8, 16, %s907_s9, [#allocation4]  }
 0x3ad   :  { %722 = dma.done.wait [#allocation4], 16  }
 0x3ae   :  { %723 = vsyncadd [#allocation4], 4294967280 }
 0x3af   :  { %562 = vsyncpa [#allocation4], 1 }

</bundles_post_ra>
